<compile_context>
chip_gen: v5e
topology: v5e:2x2
jax: 0.10.0
libtpu: 0.0.40
codegen_flags: <defaults>
</compile_context>

<pallas_src>
import jax
import jax.numpy as jnp
from jax import lax
from jax.experimental import pallas as pl
from jax.experimental.pallas import tpu as pltpu


def _round_up(x, m):
    return (x + m - 1) // m * m


def _vmem_capacity_bytes():
    """Per-core VMEM capacity; 128 MiB (v5e/v6e), 64 MiB (v7x)."""
    try:
        cap = getattr(pltpu.get_tpu_info(), "vmem_capacity_bytes", None)
        if cap:
            return int(cap)
    except Exception:
        pass
    try:
        kind = jax.devices()[0].device_kind.lower()
    except Exception:
        kind = ""
    if "v7" in kind:
        return 64 * 1024 * 1024
    if ("v5" in kind) or ("v6" in kind):
        return 128 * 1024 * 1024
    return 64 * 1024 * 1024          # conservative unknown-generation fallback


_ONEHOT_MAX_VOCAB = 2048             # one-hot MXU gather only for small vocab
_RESIDENT_TRAFFIC_FACTOR = 8         # table_bytes <= 8x gathered bytes -> Path A
_GATHER_SEMS = 8                     # DMA-semaphore ring for Path B


# ---------------------------------------------------------------------------
# Path A: resident table (single VMEM copy), one-hot MXU gather per T tokens.
# ---------------------------------------------------------------------------
def _emb_onehot_kernel(ids_ref, emb_ref, out_ref):
    # ids_ref : VMEM (T, 1) int32       -- token ids for this block
    # emb_ref : VMEM (vocab, emb_dim)   -- full table, resident, single copy
    # out_ref : VMEM (T, emb_dim)
    t_tokens = out_ref.shape[0]
    vocab = emb_ref.shape[0]
    ids = ids_ref[...]                                             # (T, 1)
    iota = lax.broadcasted_iota(jnp.int32, (t_tokens, vocab), 1)   # (T, vocab)
    onehot = (ids == iota).astype(emb_ref.dtype)                   # (T, vocab)
    out_ref[...] = jnp.dot(
        onehot, emb_ref[...], preferred_element_type=jnp.float32
    ).astype(out_ref.dtype)


def _embedding_onehot(ids_p, emb_mat, t_tokens, vmem_limit_bytes):
    padded_seq = ids_p.shape[0]
    vocab, emb_dim = emb_mat.shape
    num_blocks = padded_seq // t_tokens
    itemsize = emb_mat.dtype.itemsize
    table_bytes = vocab * emb_dim * itemsize

    cost = pl.CostEstimate(
        flops=2 * padded_seq * vocab * emb_dim,
        transcendentals=0,
        bytes_accessed=int(table_bytes + padded_seq * 4
                           + padded_seq * emb_dim * itemsize),
    )
    # Megacore (v7x): each core would DMA its own private copy of the table;
    # only shard the token axis when there are enough blocks to pay for it.
    semantics = ("parallel",) if num_blocks >= 4 else ("arbitrary",)

    return pl.pallas_call(
        _emb_onehot_kernel,
        out_shape=jax.ShapeDtypeStruct((padded_seq, emb_dim), emb_mat.dtype),
        grid=(num_blocks,),
        in_specs=[
            pl.BlockSpec((t_tokens, 1), lambda i: (i, 0)),
            # Whole table, single-buffered, stays resident across all steps.
            pl.BlockSpec(memory_space=pltpu.MemorySpace.VMEM),
        ],
        out_specs=pl.BlockSpec((t_tokens, emb_dim), lambda i: (i, 0)),
        compiler_params=pltpu.CompilerParams(
            dimension_semantics=semantics,
            vmem_limit_bytes=vmem_limit_bytes,
        ),
        cost_estimate=cost,
    )(ids_p, emb_mat)


# ---------------------------------------------------------------------------
# Path B: large-vocab gather -- table stays in HBM, manual batched row DMAs.
# ---------------------------------------------------------------------------
def _emb_hbm_gather_kernel(ids_ref, emb_hbm, out_ref, row_buf, sems):
    # ids_ref : SMEM (padded_seq,) int32   (scalar-prefetched)
    # emb_hbm : ANY  (vocab, emb_dim)      (never copied wholesale)
    # out_ref : VMEM (T, emb_dim)
    # row_buf : VMEM (T, emb_dim) scratch
    # sems    : DMA semaphores (_GATHER_SEMS,)
    block = pl.program_id(0)
    t_tokens = out_ref.shape[0]
    base = block * t_tokens
    unroll = True if t_tokens <= 32 else 8

    # Issue all T row DMAs (many outstanding), semaphores used as a ring.
    def issue(t, carry):
        row = ids_ref[base + t]
        pltpu.make_async_copy(
            emb_hbm.at[pl.ds(row, 1), :],
            row_buf.at[pl.ds(t, 1), :],
            sems.at[t % _GATHER_SEMS],
        ).start()
        return carry

    lax.fori_loop(0, t_tokens, issue, 0, unroll=unroll)

    # Wait for all of them (byte counts balance out on the shared sems).
    def drain(t, carry):
        pltpu.make_async_copy(
            emb_hbm.at[pl.ds(0, 1), :],
            row_buf.at[pl.ds(t, 1), :],
            sems.at[t % _GATHER_SEMS],
        ).wait()
        return carry

    lax.fori_loop(0, t_tokens, drain, 0, unroll=unroll)

    # Dense (T, emb_dim) writeback tile.
    out_ref[...] = row_buf[...]


def _embedding_hbm_gather(ids_p, emb_mat, t_tokens):
    padded_seq = ids_p.shape[0]
    vocab, emb_dim = emb_mat.shape
    num_blocks = padded_seq // t_tokens
    itemsize = emb_mat.dtype.itemsize

    cost = pl.CostEstimate(
        flops=0,
        transcendentals=0,
        bytes_accessed=int(2 * padded_seq * emb_dim * itemsize + padded_seq * 4),
    )

    return pl.pallas_call(
        _emb_hbm_gather_kernel,
        out_shape=jax.ShapeDtypeStruct((padded_seq, emb_dim), emb_mat.dtype),
        grid_spec=pltpu.PrefetchScalarGridSpec(
            num_scalar_prefetch=1,                       # ids -> SMEM
            grid=(num_blocks,),
            in_specs=[pl.BlockSpec(memory_space=pl.ANY)],  # table stays in HBM
            out_specs=pl.BlockSpec((t_tokens, emb_dim), lambda i, ids: (i, 0)),
            scratch_shapes=[
                pltpu.VMEM((t_tokens, emb_dim), emb_mat.dtype),
                pltpu.SemaphoreType.DMA((_GATHER_SEMS,)),
            ],
        ),
        compiler_params=pltpu.CompilerParams(
            dimension_semantics=("arbitrary",),
        ),
        cost_estimate=cost,
    )(ids_p, emb_mat)


# ---------------------------------------------------------------------------
# Wrapper (matches torch: gather rows of emb_mat by x[0], view(1, S, -1)).
# ---------------------------------------------------------------------------
def embedding_forward(x, emb_mat, *, max_block_tokens=512, gather_block_tokens=128):
    """x: (1, seq_len) integer token ids; emb_mat: (vocab, emb_dim) float.

    Returns (1, seq_len, emb_dim).
    PyTorch would error on out-of-range ids; here they are clamped (cheap,
    avoids OOB HBM DMAs / VMEM reads).
    """
    vocab, emb_dim = emb_mat.shape
    seq_len = x.shape[1]
    ids = jnp.clip(x[0].astype(jnp.int32), 0, vocab - 1)

    itemsize = emb_mat.dtype.itemsize
    table_bytes = vocab * emb_dim * itemsize
    useful_bytes = seq_len * emb_dim * itemsize

    vmem_cap = _vmem_capacity_bytes()
    budget = int(vmem_cap * 0.75)

    # Path A budget: single-buffered table + double-buffered ids/out tiles +
    # one-hot intermediate + slack.
    t_a = min(max_block_tokens, _round_up(seq_len, 8))
    need_a = (table_bytes
              + 2 * t_a * 4
              + 2 * t_a * emb_dim * itemsize
              + t_a * vocab * 4
              + (4 << 20))

    use_resident = (
        vocab <= _ONEHOT_MAX_VOCAB
        and need_a <= budget
        # Path A streams the whole table HBM->VMEM each call; only worth it
        # when that is comparable to the bytes actually gathered (or tiny).
        and table_bytes <= max(_RESIDENT_TRAFFIC_FACTOR * useful_bytes, 1 << 20)
    )

    if use_resident:
        padded_seq = _round_up(seq_len, t_a)
        ids_p = jnp.pad(ids, (0, padded_seq - seq_len)).reshape(padded_seq, 1)
        vmem_limit = min(vmem_cap, max(need_a, 32 << 20))
        out = _embedding_onehot(ids_p, emb_mat, t_a, vmem_limit)
    else:
        t_b = min(gather_block_tokens, _round_up(seq_len, 8))
        padded_seq = _round_up(seq_len, t_b)
        ids_p = jnp.pad(ids, (0, padded_seq - seq_len))   # pad with id 0 (valid)
        out = _embedding_hbm_gather(ids_p, emb_mat, t_b)

    out = out[:seq_len]
    return out.reshape(1, seq_len, emb_dim)    # matches v.view(1, seq_len, -1)


if __name__ == "__main__":
    key = jax.random.PRNGKey(0)
    k1, k2, k3, k4, k5, k6 = jax.random.split(key, 6)

    # Case 1: SeqNet-sized (Path A, one-hot MXU gather).
    vocab, emb_dim, seq_len = 32, 128, 8
    emb_mat = jax.random.normal(k1, (vocab, emb_dim), dtype=jnp.float32)
    x = jax.random.randint(k2, (1, seq_len), 0, vocab, dtype=jnp.int32)
    out = jax.block_until_ready(embedding_forward(x, emb_mat))
    ref = jnp.take(emb_mat, x[0], axis=0).reshape(1, seq_len, emb_dim)
    assert out.shape == (1, seq_len, emb_dim)
    assert jnp.allclose(out, ref, atol=1e-5), "mismatch vs reference (case 1)"

    # Case 2: non-multiple-of-8 seq_len, non-multiple-of-128 emb_dim (Path A,
    # exercises padding + unaligned dot shapes).
    vocab2, emb_dim2, seq_len2 = 1000, 96, 300
    emb_mat2 = jax.random.normal(k3, (vocab2, emb_dim2), dtype=jnp.float32)
    x2 = jax.random.randint(k4, (1, seq_len2), 0, vocab2, dtype=jnp.int32)
    out2 = jax.block_until_ready(embedding_forward(x2, emb_mat2))
    ref2 = jnp.take(emb_mat2, x2[0], axis=0).reshape(1, seq_len2, emb_dim2)
    assert out2.shape == (1, seq_len2, emb_dim2)
    assert jnp.allclose(out2, ref2, atol=1e-5), "mismatch vs reference (case 2)"

    # Case 3: large vocab, short sequence -> Path B (manual HBM row gather).
    vocab3, emb_dim3, seq_len3 = 8192, 128, 16
    emb_mat3 = jax.random.normal(k5, (vocab3, emb_dim3), dtype=jnp.float32)
    x3 = jax.random.randint(k6, (1, seq_len3), 0, vocab3, dtype=jnp.int32)
    out3 = jax.block_until_ready(embedding_forward(x3, emb_mat3))
    ref3 = jnp.take(emb_mat3, x3[0], axis=0).reshape(1, seq_len3, emb_dim3)
    assert out3.shape == (1, seq_len3, emb_dim3)
    assert jnp.allclose(out3, ref3, atol=1e-5), "mismatch vs reference (case 3)"

    print("KERNEL_OK")
</pallas_src>

<mosaic_0001>
module attributes {stable_mosaic.version = 11 : i64} {
  func.func @_emb_onehot_kernel(%arg0: i32, %arg1: memref<8x1xi32, #tpu.memory_space<vmem>>, %arg2: memref<32x128xf32, #tpu.memory_space<vmem>>, %arg3: memref<8x128xf32, #tpu.memory_space<vmem>>) attributes {dimension_semantics = [#tpu.dimension_semantics<arbitrary>], iteration_bounds = array<i64: 1>, scalar_prefetch = 0 : i64, scratch_operands = 0 : i64, tpu.core_type = #tpu.core_type<tc>, window_params = [{transform_indices = @transform_0, window_bounds = array<i64: 8, 1>}, {pipeline_mode = #tpu.pipeline_mode<synchronous>, transform_indices = @transform_1, window_bounds = array<i64: 32, 128>}, {transform_indices = @transform_2, window_bounds = array<i64: 8, 128>}]} {
    %c0 = arith.constant 0 : index
    %c0_0 = arith.constant 0 : index
    %0 = vector.load %arg1[%c0, %c0_0] : memref<8x1xi32, #tpu.memory_space<vmem>>, vector<8x1xi32>
    %1 = tpu.iota {dimensions = array<i32: 1>} : vector<8x32xi32>
    %2 = vector.broadcast %0 : vector<8x1xi32> to vector<8x32xi32>
    %3 = arith.cmpi eq, %2, %1 : vector<8x32xi32>
    %4 = arith.extui %3 : vector<8x32xi1> to vector<8x32xi32>
    %5 = arith.sitofp %4 : vector<8x32xi32> to vector<8x32xf32>
    %c0_1 = arith.constant 0 : index
    %c0_2 = arith.constant 0 : index
    %6 = vector.load %arg2[%c0_1, %c0_2] : memref<32x128xf32, #tpu.memory_space<vmem>>, vector<32x128xf32>
    %cst = arith.constant dense<0.000000e+00> : vector<8x128xf32>
    %7 = tpu.matmul %5, %6, %cst {dimension_numbers = #tpu.dot_dimension_numbers<[1], [0], [0], [1], [0, 0, 1, 1], [], []>} : vector<8x32xf32>, vector<32x128xf32>, vector<8x128xf32> -> vector<8x128xf32>
    %c0_3 = arith.constant 0 : index
    %c0_4 = arith.constant 0 : index
    %8 = vector.load %arg3[%c0_3, %c0_4] : memref<8x128xf32, #tpu.memory_space<vmem>>, vector<8x128xf32>
    tpu.vector_store %arg3[%c0_3, %c0_4], %7 {strides = array<i32>} : memref<8x128xf32, #tpu.memory_space<vmem>>, vector<8x128xf32>,
    return
  }
  func.func @transform_0(%arg0: i32) -> (i32, i32) {
    %c0_i32 = arith.constant 0 : i32
    %c0_i32_0 = arith.constant 0 : i32
    return %arg0, %c0_i32 : i32, i32
  }
  func.func @transform_1(%arg0: i32) -> (i32, i32) {
    %c0_i32 = arith.constant 0 : i32
    %c0_i32_0 = arith.constant 0 : i32
    %c0_i32_1 = arith.constant 0 : i32
    return %c0_i32, %c0_i32_0 : i32, i32
  }
  func.func @transform_2(%arg0: i32) -> (i32, i32) {
    %c0_i32 = arith.constant 0 : i32
    %c0_i32_0 = arith.constant 0 : i32
    return %arg0, %c0_i32 : i32, i32
  }
}

</mosaic_0001>

<bundles_post_ra>
// kernel: tpu_custom_call.1
= control target key start
LH: loop header
LB: loop body
LE: loop exit
PB: predicated region body
PF: predicated region fallthrough
CT: control target
= control target key end

     0   :  { %7 = vsyncpa [#allocation3], 0  ;;  %s174_s0 = inlined_call_operand.vmem [shape: s32[8,1], index: 0, kind: input, shape index: {}]   ;;  %s175_s1 = inlined_call_operand.hbm [shape: f32[32,128], index: 1, kind: input, shape index: {}]   ;;  %s176_s2 = inlined_call_operand.hbm [shape: f32[8,128], index: 2, kind: output, shape index: {}]  }
   0x1   :  { %8 = vsyncpa [#allocation4], 0  ;;  %s15_s11 = sshll.u32 %s175_s1, 4  ;;  %s144_s12 = smov [#allocation2]   ;;  %s16_s11 = int_to_ptr.hbm [resolvable:$true] %s15_s11 }
   0x2   :  { %s17_s13 = sshll.u32 %s144_s12, 4  ;;  %s145_s14 = smov 128   ;;  %s18_s13 = int_to_ptr.vmem [resolvable:$true] %s17_s13 }
   0x3   :  { %s146_s15 = smov 8  }
   0x4   :  { %23 = dma.hbm_to_vmem [thread:$0]  %s16_s11, 512, %s18_s13, [#allocation3], %s145_s14, %s145_s14, %s146_s15  }
   0x5   :  { %140 = dma.done.wait [#allocation3], 512  }
   0x6   :  { %141 = vsyncadd [#allocation3], 4294966784  ;;  %v147_v0 = vmov 0   ;;  %v28_v1 = vld [vmem:[%s174_s0] sm:$0xff]  ;;  %v40_v2 = vld [vmem:[#allocation2 + $0x18] sm:$0xff]  ;;  %v29_v6 = vlaneseq  ;;  %vm41_vm0 = vcmask 261120  }
   0x7   :  { %91 = vset.pattern.permute.xlu0 %v147_v0  ;;  %v39_v3 = vld [vmem:[#allocation2 + $0x10] sm:$0xff]  ;;  %57 = vmatpush.msra.mxu0 %v40_v2  ;;  %v38_v4 = vld [vmem:[#allocation2 + $0x8] sm:$0xff]  ;;  %v37_v5 = vld [vmem:[#allocation2] sm:$0xff]  ;;  %v148_v9 = vmov 0.0   ;;  %s149_s1 = smov [#allocation5]   ;;  %s73_s20 = sshll.u32 %s176_s2, 4  ;;  %s74_s20 = int_to_ptr.hbm [resolvable:$true] %s73_s20 }
   0x8   :  { %32 = vperm.xlu0 %91, %v28_v1   ;;  %v30_v7 = vand.u32 127, %v29_v6  ;;  %s71_s18 = sshll.u32 %s149_s1, 4  ;;  %s72_s18 = int_to_ptr.vmem [resolvable:$true] %s71_s18 }
   0x9   :  { %58 = vmatpush.msra.mxu0 %v39_v3 }
   0xb   :  { %59 = vmatpush.msra.mxu0 %v38_v4 }
   0xd   :  { %60 = vmatpush.msra.mxu0 %v37_v5 }
  0x7a   :  { %v33_v8 = vpop.permute.xlu0 %32 }
  0x7b   :  { %vm34_vm1 = vcmp.eq.s32.totalorder %v33_v8, %v30_v7 }
  0x7c   :  { %v83_v10 = vsel %vm34_vm1, 1.0, %v148_v9 }
  0x7d   :  { %84 = vmatmul.msk.f32.vlgmr.msra.gmra.mxu0 %vm41_vm0, %v83_v10 }
  0xfa   :  { %v62_v11 = vpop.f32.mrf.mxu0 }
  0xfb   :  { %65 = vst [vmem:[#allocation5] sm:$0xff] %v62_v11 }
  0xfc   :  { %76 = dma.vmem_to_hbm [thread:$0]  %s72_s18, 128, %s74_s20, [#allocation4]  }
  0xfd   :  { %142 = dma.done.wait [#allocation4], 128  }
  0xfe   :  { %143 = vsyncadd [#allocation4], 4294967168 }
  0xff   :  { %81 = vsyncpa [#allocation3], 1 }
 0x100   :  { %82 = vsyncpa [#allocation4], 1 }

</bundles_post_ra>
